<compile_context>
chip_gen: v5e
topology: v5e:2x2
jax: 0.10.0
libtpu: 0.0.40
codegen_flags: <defaults>
</compile_context>

<pallas_src>
import jax
import jax.numpy as jnp
from jax.experimental import pallas as pl
from jax.experimental.pallas import tpu as pltpu


# Tile caps: chosen so 2x(tm*tk + tk*tn + tm*tn) + acc stays well under 32 MiB
# (v7x scoped default) even with f32 activations.
_TM_CAP = 256
_TN_CAP = 512
_TK_CAP = 1024


def _round_up(x, m):
    return ((x + m - 1) // m) * m


def _cdiv(a, b):
    return (a + b - 1) // b


def _balanced_tile(dim, granule, cap):
    """Tile size (multiple of `granule`, <= ~cap) that covers `dim` with at most
    one granule of padding waste (instead of rounding dim up to the cap)."""
    if dim <= cap:
        return _round_up(dim, granule)
    n_tiles = _cdiv(dim, cap)
    return _round_up(_cdiv(dim, n_tiles), granule)


# --------------------------------------------------------------------------- #
# Kernels
# --------------------------------------------------------------------------- #
def _linear_kernel_acc(x_ref, w_ref, b_ref, o_ref, acc_ref):
    # x_ref: (tm, tk) f32   w_ref: (tk, tn) bf16   b_ref: (1, tn) f32
    # o_ref: (tm, tn)       acc_ref: (tm, tn) f32 scratch, resident across K.
    k = pl.program_id(2)

    @pl.when(k == 0)
    def _():
        acc_ref[...] = jnp.zeros_like(acc_ref)

    # Cast the activation tile to bf16 in-register; MXU accumulates in f32.
    acc_ref[...] += jnp.dot(
        x_ref[...].astype(w_ref.dtype),
        w_ref[...],
        preferred_element_type=jnp.float32,
    )

    @pl.when(k == pl.num_programs(2) - 1)
    def _():
        o_ref[...] = (acc_ref[...] + b_ref[...]).astype(o_ref.dtype)


def _linear_kernel_single_k(x_ref, w_ref, b_ref, o_ref):
    # Kp//tk == 1 fast path: no reduction loop, no accumulator scratch.
    acc = jnp.dot(
        x_ref[...].astype(w_ref.dtype),
        w_ref[...],
        preferred_element_type=jnp.float32,
    )
    o_ref[...] = (acc + b_ref[...]).astype(o_ref.dtype)


# --------------------------------------------------------------------------- #
# Wrapper
# --------------------------------------------------------------------------- #
def linear_forward(x, weight_t_p, bias_p, *, n_true, k_true, tn, tk):
    """y = x @ W.T + b with a pre-padded, pre-transposed (Kp, Np) bf16 weight."""
    M, K = x.shape
    assert K == k_true, "x feature dim does not match the layer's inputSize"
    Kp, Np = weight_t_p.shape

    tm = _balanced_tile(M, 8, _TM_CAP)
    Mp = _round_up(M, tm)

    # Only the activation is padded per call; skipped when already aligned.
    if (Mp, Kp) != (M, K):
        x_p = jnp.pad(x, ((0, Mp - M), (0, Kp - K)))
    else:
        x_p = x

    grid_m, grid_n, grid_k = Mp // tm, Np // tn, Kp // tk

    out_bytes = Mp * Np * jnp.dtype(x.dtype).itemsize
    cost = pl.CostEstimate(
        flops=2 * Mp * Np * Kp,
        transcendentals=0,
        bytes_accessed=(
            x_p.size * x_p.dtype.itemsize
            + weight_t_p.size * weight_t_p.dtype.itemsize
            + bias_p.size * bias_p.dtype.itemsize
            + out_bytes
        ),
    )

    # Double-buffered pipeline footprint (bytes) -> scoped VMEM limit with
    # margin; clamped so it is valid on every generation (v7x: 64 MiB/TC).
    footprint = (
        2 * (tm * tk * x_p.dtype.itemsize
             + tk * tn * weight_t_p.dtype.itemsize
             + tn * bias_p.dtype.itemsize
             + tm * tn * jnp.dtype(x.dtype).itemsize)
        + tm * tn * 4  # f32 accumulator
    )
    vmem_limit = int(min(max(2 * footprint, 32 << 20), 64 << 20))

    if grid_k == 1:
        out_p = pl.pallas_call(
            _linear_kernel_single_k,
            out_shape=jax.ShapeDtypeStruct((Mp, Np), x.dtype),
            grid_spec=pltpu.PrefetchScalarGridSpec(
                num_scalar_prefetch=0,
                grid=(grid_m, grid_n),
                in_specs=[
                    pl.BlockSpec((tm, Kp), lambda i, j: (i, 0)),   # x
                    pl.BlockSpec((Kp, tn), lambda i, j: (0, j)),   # W.T (K,N) bf16
                    pl.BlockSpec((1, tn), lambda i, j: (0, j)),    # bias
                ],
                out_specs=pl.BlockSpec((tm, tn), lambda i, j: (i, j)),
            ),
            compiler_params=pltpu.CompilerParams(
                dimension_semantics=("parallel", "parallel"),
                vmem_limit_bytes=vmem_limit,
            ),
            cost_estimate=cost,
        )(x_p, weight_t_p, bias_p)
    else:
        out_p = pl.pallas_call(
            _linear_kernel_acc,
            out_shape=jax.ShapeDtypeStruct((Mp, Np), x.dtype),
            grid_spec=pltpu.PrefetchScalarGridSpec(
                num_scalar_prefetch=0,
                grid=(grid_m, grid_n, grid_k),
                in_specs=[
                    pl.BlockSpec((tm, tk), lambda i, j, k: (i, k)),   # x
                    pl.BlockSpec((tk, tn), lambda i, j, k: (k, j)),   # W.T (K,N) bf16
                    pl.BlockSpec((1, tn), lambda i, j, k: (0, j)),    # bias (resident over K)
                ],
                out_specs=pl.BlockSpec((tm, tn), lambda i, j, k: (i, j)),
                scratch_shapes=[pltpu.VMEM((tm, tn), jnp.float32)],
            ),
            compiler_params=pltpu.CompilerParams(
                dimension_semantics=("parallel", "parallel", "arbitrary"),
                vmem_limit_bytes=vmem_limit,
            ),
            cost_estimate=cost,
        )(x_p, weight_t_p, bias_p)

    return out_p[:M, :n_true]


class LinearRegression:
    """JAX/Pallas port of the PyTorch LinearRegression module (forward only)."""

    WEIGHT_DTYPE = jnp.bfloat16  # streamed weight dtype (HBM-bound layer)

    def __init__(self, inputSize, outputSize, key):
        kw, kb = jax.random.split(key)
        # PyTorch nn.Linear default init: U(-1/sqrt(in), 1/sqrt(in)),
        # weight layout (outputSize, inputSize) kept as f32 master copy.
        bound = 1.0 / (inputSize ** 0.5)
        self.weight = jax.random.uniform(
            kw, (outputSize, inputSize), jnp.float32, -bound, bound
        )
        self.bias = jax.random.uniform(
            kb, (outputSize,), jnp.float32, -bound, bound
        )

        self.K, self.N = inputSize, outputSize
        # Fixed-dim tiles chosen once (padding-minimizing), then the weight and
        # bias are padded / transposed / cast exactly once.
        self.tk = _balanced_tile(self.K, 128, _TK_CAP)
        self.tn = _balanced_tile(self.N, 128, _TN_CAP)
        self.Kp = _round_up(self.K, self.tk)
        self.Np = _round_up(self.N, self.tn)

        w_t = jnp.asarray(self.weight).T                      # (K, N)
        self.weight_t_p = jnp.pad(
            w_t, ((0, self.Kp - self.K), (0, self.Np - self.N))
        ).astype(self.WEIGHT_DTYPE)                           # (Kp, Np) bf16
        self.bias_p = jnp.pad(
            self.bias.reshape(1, self.N), ((0, 0), (0, self.Np - self.N))
        )                                                     # (1, Np) f32

    def __call__(self, x):
        return linear_forward(
            x, self.weight_t_p, self.bias_p,
            n_true=self.N, k_true=self.K, tn=self.tn, tk=self.tk,
        )


if __name__ == "__main__":
    key = jax.random.PRNGKey(0)
    k_x, k_params = jax.random.split(key)

    # Shapes mirroring the script's `torch.rand(5, 7)` usage:
    # batch=5 samples, inputSize=7, outputSize=3.
    batch, input_size, output_size = 5, 7, 3
    x = jax.random.uniform(k_x, (batch, input_size), jnp.float32)

    model = LinearRegression(input_size, output_size, k_params)
    out = model(x)
    out = jax.block_until_ready(out)
    assert out.shape == (batch, output_size)

    # Tight check against a bf16-quantized reference (matches the kernel's
    # bf16 operands / f32 accumulation).
    w_q = model.weight.astype(jnp.bfloat16).astype(jnp.float32)
    x_q = x.astype(jnp.bfloat16).astype(jnp.float32)
    ref_q = x_q @ w_q.T + model.bias
    assert jnp.allclose(out, ref_q, atol=1e-4, rtol=1e-4)

    # Loose check against the full-f32 torch.nn.Linear semantics.
    ref_f32 = x @ model.weight.T + model.bias
    assert jnp.allclose(out, ref_f32, atol=3e-2, rtol=3e-2)

    print("KERNEL_OK")
</pallas_src>

<mosaic_0001>
module attributes {stable_mosaic.version = 11 : i64} {
  func.func @_linear_kernel_single_k(%arg0: i32, %arg1: i32, %arg2: memref<8x128xf32, #tpu.memory_space<vmem>>, %arg3: memref<128x128xbf16, #tpu.memory_space<vmem>>, %arg4: memref<1x128xf32, #tpu.memory_space<vmem>>, %arg5: memref<8x128xf32, #tpu.memory_space<vmem>>) attributes {dimension_semantics = [#tpu.dimension_semantics<parallel>, #tpu.dimension_semantics<parallel>], iteration_bounds = array<i64: 1, 1>, scalar_prefetch = 0 : i64, scratch_operands = 0 : i64, tpu.core_type = #tpu.core_type<tc>, window_params = [{transform_indices = @transform_0, window_bounds = array<i64: 8, 128>}, {transform_indices = @transform_1, window_bounds = array<i64: 128, 128>}, {transform_indices = @transform_2, window_bounds = array<i64: 1, 128>}, {transform_indices = @transform_3, window_bounds = array<i64: 8, 128>}]} {
    %c0 = arith.constant 0 : index
    %c0_0 = arith.constant 0 : index
    %0 = vector.load %arg2[%c0, %c0_0] : memref<8x128xf32, #tpu.memory_space<vmem>>, vector<8x128xf32>
    %1 = arith.truncf %0 : vector<8x128xf32> to vector<8x128xbf16>
    %c0_1 = arith.constant 0 : index
    %c0_2 = arith.constant 0 : index
    %2 = vector.load %arg3[%c0_1, %c0_2] : memref<128x128xbf16, #tpu.memory_space<vmem>>, vector<128x128xbf16>
    %cst = arith.constant dense<0.000000e+00> : vector<8x128xf32>
    %3 = tpu.matmul %1, %2, %cst {dimension_numbers = #tpu.dot_dimension_numbers<[1], [0], [0], [1], [0, 0, 1, 1], [], []>} : vector<8x128xbf16>, vector<128x128xbf16>, vector<8x128xf32> -> vector<8x128xf32>
    %c0_3 = arith.constant 0 : index
    %c0_4 = arith.constant 0 : index
    %4 = vector.load %arg4[%c0_3, %c0_4] : memref<1x128xf32, #tpu.memory_space<vmem>>, vector<1x128xf32>
    %5 = vector.broadcast %4 : vector<1x128xf32> to vector<8x128xf32>
    %6 = arith.addf %3, %5 : vector<8x128xf32>
    %c0_5 = arith.constant 0 : index
    %c0_6 = arith.constant 0 : index
    %7 = vector.load %arg5[%c0_5, %c0_6] : memref<8x128xf32, #tpu.memory_space<vmem>>, vector<8x128xf32>
    tpu.vector_store %arg5[%c0_5, %c0_6], %6 {strides = array<i32>} : memref<8x128xf32, #tpu.memory_space<vmem>>, vector<8x128xf32>,
    return
  }
  func.func @transform_0(%arg0: i32, %arg1: i32) -> (i32, i32) {
    %c0_i32 = arith.constant 0 : i32
    %c0_i32_0 = arith.constant 0 : i32
    return %arg0, %c0_i32 : i32, i32
  }
  func.func @transform_1(%arg0: i32, %arg1: i32) -> (i32, i32) {
    %c0_i32 = arith.constant 0 : i32
    %c0_i32_0 = arith.constant 0 : i32
    return %c0_i32, %arg1 : i32, i32
  }
  func.func @transform_2(%arg0: i32, %arg1: i32) -> (i32, i32) {
    %c0_i32 = arith.constant 0 : i32
    %c0_i32_0 = arith.constant 0 : i32
    return %c0_i32, %arg1 : i32, i32
  }
  func.func @transform_3(%arg0: i32, %arg1: i32) -> (i32, i32) {
    %c0_i32 = arith.constant 0 : i32
    return %arg0, %arg1 : i32, i32
  }
}

</mosaic_0001>

<bundles_post_ra>
// kernel: tpu_custom_call.1
= control target key start
LH: loop header
LB: loop body
LE: loop exit
PB: predicated region body
PF: predicated region fallthrough
CT: control target
= control target key end

     0   :  { %8 = vsyncpa [#allocation3], 0  ;;  %s308_s0 = inlined_call_operand.hbm [shape: f32[8,128], index: 0, kind: input, shape index: {}]   ;;  %s309_s1 = inlined_call_operand.hbm [shape: bf16[128,128], index: 1, kind: input, shape index: {}]   ;;  %s310_s2 = inlined_call_operand.vmem [shape: f32[1,128], index: 2, kind: input, shape index: {}]   ;;  %s311_s3 = inlined_call_operand.hbm [shape: f32[8,128], index: 3, kind: output, shape index: {}]  }
   0x1   :  { %9 = vsyncpa [#allocation6], 0 }
   0x2   :  { %10 = vsyncpa [#allocation4], 0  ;;  %s16_s14 = sshll.u32 %s308_s0, 4  ;;  %s271_s15 = smov [#allocation2]   ;;  %s17_s14 = int_to_ptr.hbm [resolvable:$true] %s16_s14 }
   0x3   :  { %s18_s16 = sshll.u32 %s271_s15, 4  ;;  %s26_s19 = sshll.u32 %s309_s1, 4  ;;  %s19_s16 = int_to_ptr.vmem [resolvable:$true] %s18_s16  ;;  %s27_s19 = int_to_ptr.hbm [resolvable:$true] %s26_s19 }
   0x4   :  { %21 = dma.hbm_to_vmem [thread:$0]  %s17_s14, 128, %s19_s16, [#allocation3]  }
   0x5   :  { %s272_s20 = smov [#allocation5]   ;;  %s273_s22 = smov 64  }
   0x6   :  { %s28_s21 = sshll.u32 %s272_s20, 4  ;;  %s274_s23 = smov 4   ;;  %s29_s21 = int_to_ptr.vmem [resolvable:$true] %s28_s21 }
   0x7   :  { %34 = dma.hbm_to_vmem [thread:$0]  %s27_s19, 1024, %s29_s21, [#allocation6], %s273_s22, %s273_s22, %s274_s23  }
   0x8   :  { %265 = dma.done.wait [#allocation3], 128  }
   0x9   :  { %266 = vsyncadd [#allocation3], 4294967168 }
   0xa   :  { %267 = dma.done.wait [#allocation6], 1024  }
   0xb   :  { %268 = vsyncadd [#allocation6], 4294966272  ;;  %v186_v0 = vld [vmem:[#allocation5 + $0x38] sm:$0xff]  ;;  %v185_v1 = vld [vmem:[#allocation5 + $0x30] sm:$0xff]  ;;  %s275_s24 = smov [#allocation7]   ;;  %s136_s28 = sshll.u32 %s311_s3, 4  ;;  %s137_s28 = int_to_ptr.hbm [resolvable:$true] %s136_s28 }
   0xc   :  { %115 = vmatpush.bf16.msra.mxu0 %v186_v0  ;;  %v184_v2 = vld [vmem:[#allocation5 + $0x28] sm:$0xff]  ;;  %v183_v3 = vld [vmem:[#allocation5 + $0x20] sm:$0xff]  ;;  %v182_v4 = vld [vmem:[#allocation5 + $0x18] sm:$0xff]  ;;  %s134_s25 = sshll.u32 %s275_s24, 4  ;;  %s135_s25 = int_to_ptr.vmem [resolvable:$true] %s134_s25 }
   0xd   :  { %v181_v5 = vld [vmem:[#allocation5 + $0x10] sm:$0xff]  ;;  %v180_v6 = vld [vmem:[#allocation5 + $0x8] sm:$0xff]  ;;  %v179_v7 = vld [vmem:[#allocation5] sm:$0xff] }
   0xe   :  { %v45_v8 = vld [vmem:[#allocation2] sm:$0xff] }
   0xf   :  { %v46_v9 = vpack.c.bf16 %v45_v8, %v45_v8  ;;  %v192_v10 = vld [vmem:[%s310_s2] ss:$0 sm:$0xff] }
  0x10   :  { %116 = vmatpush.bf16.msra.mxu0 %v185_v1 }
  0x14   :  { %117 = vmatpush.bf16.msra.mxu0 %v184_v2 }
  0x18   :  { %118 = vmatpush.bf16.msra.mxu0 %v183_v3 }
  0x1c   :  { %119 = vmatpush.bf16.msra.mxu0 %v182_v4 }
  0x20   :  { %120 = vmatpush.bf16.msra.mxu0 %v181_v5 }
  0x24   :  { %121 = vmatpush.bf16.msra.mxu0 %v180_v6 }
  0x28   :  { %122 = vmatpush.bf16.msra.mxu0 %v179_v7 }
  0x2b   :  { %123 = vmatmul.bf16.vlgmr.msra.gmra.mxu0 %v46_v9 }
  0xa8   :  { %v124_v11 = vpop.f32.mrf.mxu0 }
  0xa9   :  { %v125_v12 = vadd.f32 %v192_v10, %v124_v11 }
  0xab   :  { %128 = vst [vmem:[#allocation7] sm:$0xff] %v125_v12 }
  0xac   :  { %139 = dma.vmem_to_hbm [thread:$0]  %s135_s25, 128, %s137_s28, [#allocation4]  }
  0xb0   :  { %v126_v13 = vpop.f32.mrf.mxu0 }
  0xb1   :  { %269 = dma.done.wait [#allocation4], 128  }
  0xb2   :  { %270 = vsyncadd [#allocation4], 4294967168 }
  0xb3   :  { %144 = vsyncpa [#allocation3], 1 }
  0xb4   :  { %145 = vsyncpa [#allocation6], 1 }
  0xb5   :  { %146 = vsyncpa [#allocation4], 1 }

</bundles_post_ra>
